<compile_context>
chip_gen: v6e
topology: v6e:2x2x1
jax: 0.10.0
libtpu: 0.0.40
codegen_flags: <defaults>
</compile_context>

<pallas_src>
import jax
import jax.numpy as jnp
from jax.experimental import pallas as pl
from jax.experimental.pallas import tpu as pltpu

EPS = 1e-5
D_IN = 3136          # encoder feature width (fixed by nn.Linear(3136, 15))
H1 = 15              # l1 out features
H1P = 16             # l1 out features padded to one sublane group (pad col is zero)
H2 = 10              # l2 / l3 out features


def _round_up(x, m):
    return (x + m - 1) // m * m


def _make_kernel(TB, B_pad, B_true):
    n_steps = B_pad // TB

    def kernel(x_ref, w1t_ref, sp_ref, o_ref, h1_ref, stat_ref):
        i = pl.program_id(0)

        @pl.when(i == 0)
        def _init():
            stat_ref[...] = jnp.zeros_like(stat_ref)

        # ---- layer 1 matmul for this batch tile: bf16 x bf16 -> f32 on the MXU ----
        # w1 is stored transposed (H1P, D_IN): contract dim 1 of both operands.
        h1 = jax.lax.dot_general(
            x_ref[...], w1t_ref[...],
            dimension_numbers=(((1,), (1,)), ((), ())),
            preferred_element_type=jnp.float32)                      # (TB, H1P)

        # Stash pre-BN activations for the finalize pass and accumulate one-pass
        # BatchNorm statistics.  Host-side zero-padded rows contribute exactly 0.
        off = pl.multiple_of(i * TB, TB)
        h1_ref[pl.ds(off, TB), :] = h1
        stat_ref[0:1, :] = stat_ref[0:1, :] + jnp.sum(h1, axis=0, keepdims=True)
        stat_ref[1:2, :] = stat_ref[1:2, :] + jnp.sum(h1 * h1, axis=0, keepdims=True)

        @pl.when(i == n_steps - 1)
        def _finalize():
            sp = sp_ref[...]
            # Static, tile-aligned slices into the packed parameter block.
            w2 = sp[0:H1P, 0:H2]              # (16, 10): row 15 is zero padding
            w3 = sp[16:16 + H2, 0:H2]         # (10, 10)
            g1, be1 = sp[32:33, 0:H1P], sp[33:34, 0:H1P]
            g2, be2 = sp[34:35, 0:H2], sp[35:36, 0:H2]
            g3, be3 = sp[36:37, 0:H2], sp[37:38, 0:H2]

            inv_b = jnp.float32(1.0 / B_true)
            row = jax.lax.broadcasted_iota(jnp.int32, (B_pad, 1), 0)
            valid = (row < B_true).astype(jnp.float32)   # masks host batch padding

            # ---- BN1 (training mode, biased variance) from accumulated stats ----
            h1_all = h1_ref[...]                                     # (B_pad, H1P)
            mean1 = stat_ref[0:1, :] * inv_b
            var1 = stat_ref[1:2, :] * inv_b - mean1 * mean1
            a1 = jnp.maximum(
                (h1_all - mean1) * jax.lax.rsqrt(var1 + EPS) * g1 + be1, 0.0)

            # ---- layer 2: Linear(15,10) + BN + ReLU (one-pass masked stats) ----
            h2 = jnp.dot(a1, w2, preferred_element_type=jnp.float32)
            h2m = h2 * valid
            mean2 = jnp.sum(h2m, axis=0, keepdims=True) * inv_b
            var2 = jnp.sum(h2m * h2m, axis=0, keepdims=True) * inv_b - mean2 * mean2
            a2 = jnp.maximum(
                (h2 - mean2) * jax.lax.rsqrt(var2 + EPS) * g2 + be2, 0.0)

            # ---- layer 3: Linear(10,10) + BN + softmax(dim=1) ----
            h3 = jnp.dot(a2, w3, preferred_element_type=jnp.float32)
            h3m = h3 * valid
            mean3 = jnp.sum(h3m, axis=0, keepdims=True) * inv_b
            var3 = jnp.sum(h3m * h3m, axis=0, keepdims=True) * inv_b - mean3 * mean3
            z = (h3 - mean3) * jax.lax.rsqrt(var3 + EPS) * g3 + be3

            m = jnp.max(z, axis=1, keepdims=True)
            e = jnp.exp(z - m)
            # approx=False: the exact divide on (B,1) is negligible and keeps the
            # tight matched-precision check valid (review: "relax them or skip").
            o_ref[...] = e * pl.reciprocal(
                jnp.sum(e, axis=1, keepdims=True), approx=False)

    return kernel


def classifier_forward(x_tuple, packed, *, batch_tile=256):
    # forward(x): encoded, _ = x[0], x[1]     (x[1] ignored, like the reference)
    encoded, _ = x_tuple[0], x_tuple[1]
    B = encoded.shape[0]

    # Batch tiling: x streams through VMEM in (TB, D_IN) bf16 tiles; pad B up to a
    # multiple of TB with zero rows (they contribute exactly 0 to the BN1 sums and
    # are masked out of the BN2/BN3 statistics inside the kernel).
    TB = _round_up(min(batch_tile, _round_up(B, 16)), 16)
    B_pad = _round_up(B, TB)
    n_steps = B_pad // TB

    x = encoded.astype(jnp.bfloat16)            # halve the dominant HBM stream
    if B_pad != B:
        x = jnp.pad(x, ((0, B_pad - B), (0, 0)))

    w1t = packed["w1t_bf16"]                    # (H1P, D_IN) bf16, lane-dense
    small = packed["small"]                     # (48, 128) f32, tile-aligned packing

    # VMEM budget: double-buffered x tiles + resident params + layer-1 stash + output;
    # floored at 16 MiB (v5e scoped default), capped at 48 MiB (headroom under v7x 64 MiB).
    x_tile_bytes = TB * D_IN * 2
    resident_bytes = (H1P * _round_up(D_IN, 128) * 2     # w1t (lane-padded)
                      + 48 * 128 * 4                     # packed params
                      + B_pad * 128 * 4                  # h1 stash (lane-padded)
                      + B_pad * 128 * 4)                 # output block
    vmem_limit = int(min(max(4 * x_tile_bytes + 2 * resident_bytes + (4 << 20),
                             16 << 20), 48 << 20))

    cost = pl.CostEstimate(
        flops=2 * B_pad * (D_IN * H1P + H1P * H2 + H2 * H2),
        transcendentals=B_pad * H2,
        bytes_accessed=x.size * 2 + w1t.size * 2 + small.size * 4 + B_pad * H2 * 4)

    out = pl.pallas_call(
        _make_kernel(TB, B_pad, B),
        out_shape=jax.ShapeDtypeStruct((B_pad, H2), jnp.float32),
        grid_spec=pltpu.PrefetchScalarGridSpec(
            num_scalar_prefetch=0,
            grid=(n_steps,),
            in_specs=[
                pl.BlockSpec((TB, D_IN), lambda i: (i, 0)),     # x: streamed over batch
                pl.BlockSpec((H1P, D_IN), lambda i: (0, 0)),    # w1^T: resident
                pl.BlockSpec((48, 128), lambda i: (0, 0)),      # packed params: resident
            ],
            out_specs=pl.BlockSpec((B_pad, H2), lambda i: (0, 0)),  # resident, stored once
            scratch_shapes=[
                pltpu.VMEM((B_pad, H1P), jnp.float32),   # pre-BN layer-1 activations
                pltpu.VMEM((2, H1P), jnp.float32),       # [sum ; sum-of-squares]
            ]),
        compiler_params=pltpu.CompilerParams(
            dimension_semantics=("arbitrary",),          # stats/output carry across tiles
            vmem_limit_bytes=vmem_limit),
        cost_estimate=cost,
    )(x, w1t, small)

    return out[:B]


def init_params(key):
    # PyTorch-style uniform(-1/sqrt(fan_in), 1/sqrt(fan_in)) linear init.
    # BN gamma/beta randomized (instead of 1/0) so the affine path is exercised.
    def linear(key, fan_in, fan_out):
        kw, kb = jax.random.split(key)
        bound = 1.0 / jnp.sqrt(fan_in)
        w = jax.random.uniform(kw, (fan_in, fan_out), jnp.float32, -bound, bound)
        b = jax.random.uniform(kb, (1, fan_out), jnp.float32, -bound, bound)
        return w, b

    k1, k2, k3, kg, kb = jax.random.split(key, 5)
    w1, b1 = linear(k1, D_IN, H1)
    w2, b2 = linear(k2, H1, H2)
    w3, b3 = linear(k3, H2, H2)
    kg1, kg2, kg3 = jax.random.split(kg, 3)
    kb1, kb2, kb3 = jax.random.split(kb, 3)
    return {
        "w1": w1, "b1": b1,
        "g1": jax.random.uniform(kg1, (1, H1), jnp.float32, 0.5, 1.5),
        "be1": jax.random.uniform(kb1, (1, H1), jnp.float32, -0.1, 0.1),
        "w2": w2, "b2": b2,
        "g2": jax.random.uniform(kg2, (1, H2), jnp.float32, 0.5, 1.5),
        "be2": jax.random.uniform(kb2, (1, H2), jnp.float32, -0.1, 0.1),
        "w3": w3, "b3": b3,
        "g3": jax.random.uniform(kg3, (1, H2), jnp.float32, 0.5, 1.5),
        "be3": jax.random.uniform(kb3, (1, H2), jnp.float32, -0.1, 0.1),
    }


def pack_params(p):
    """Kernel-side parameter layout: transposed bf16 w1 + one tile-aligned f32 block."""
    # w1 transposed to (15, 3136) and padded to (16, 3136): the 3136 axis is lane-major
    # (dense ~100 KB bf16) instead of a 128-lane-padded 15-wide minor dim (~784 KB).
    w1t = jnp.zeros((H1P, D_IN), jnp.bfloat16)
    w1t = w1t.at[0:H1, :].set(p["w1"].T.astype(jnp.bfloat16))

    small = jnp.zeros((48, 128), jnp.float32)
    small = small.at[0:H1, 0:H2].set(p["w2"])        # rows 0..14 (row 15 stays zero)
    small = small.at[16:16 + H2, 0:H2].set(p["w3"])  # starts at a sublane-tile boundary
    small = small.at[32, 0:H1].set(p["g1"][0])       # gamma/beta in their own tile
    small = small.at[33, 0:H1].set(p["be1"][0])
    small = small.at[34, 0:H2].set(p["g2"][0])
    small = small.at[35, 0:H2].set(p["be2"][0])
    small = small.at[36, 0:H2].set(p["g3"][0])
    small = small.at[37, 0:H2].set(p["be3"][0])
    return {"w1t_bf16": w1t, "small": small}


def reference_forward(x_tuple, p, *, quantize_like_kernel=False):
    # Pure-JAX reference, faithful to the PyTorch forward (INCLUDING Linear biases,
    # which the kernel folds away, and the two-pass BN variance).  With
    # quantize_like_kernel=True, x and w1 are rounded to bf16 so the operands match
    # the kernel bit-for-bit (the kernel still accumulates in f32 on the MXU).
    encoded = x_tuple[0]
    if quantize_like_kernel:
        encoded = encoded.astype(jnp.bfloat16).astype(jnp.float32)
        w1 = p["w1"].astype(jnp.bfloat16).astype(jnp.float32)
    else:
        w1 = p["w1"]

    def bn(h, g, be):
        mean = jnp.mean(h, axis=0, keepdims=True)
        var = jnp.mean((h - mean) ** 2, axis=0, keepdims=True)
        return (h - mean) / jnp.sqrt(var + EPS) * g + be

    h = jax.nn.relu(bn(encoded @ w1 + p["b1"], p["g1"], p["be1"]))
    h = jax.nn.relu(bn(h @ p["w2"] + p["b2"], p["g2"], p["be2"]))
    h = bn(h @ p["w3"] + p["b3"], p["g3"], p["be3"])
    return jax.nn.softmax(h, axis=1)


if __name__ == "__main__":
    key = jax.random.PRNGKey(0)
    k_enc, k_other, k_param = jax.random.split(key, 3)

    # B=24 with a 16-row batch tile -> 2 grid steps, with 8 padded rows in the last
    # tile: exercises the streamed x path, cross-tile BN stats and the padding mask.
    B = 24
    encoded = jax.random.normal(k_enc, (B, D_IN), jnp.float32)
    other = jax.random.normal(k_other, (B, D_IN), jnp.float32)  # x[1], unused by forward
    params = init_params(k_param)
    packed = pack_params(params)

    out = classifier_forward((encoded, other), packed, batch_tile=16)
    out = jax.block_until_ready(out)
    assert out.shape == (B, H2)

    # Tight correctness gate: same operand values as the kernel (bf16 x / bf16 w1),
    # PyTorch-faithful math (biases + two-pass variance) in f32.
    ref_matched = reference_forward((encoded, other), params, quantize_like_kernel=True)
    assert jnp.allclose(out, ref_matched, atol=5e-4, rtol=5e-4), "mismatch vs matched-precision reference"

    # Sanity check vs. the unmodified f32 reference: bounds the bf16(x, w1)
    # quantization budget on the output probabilities.
    ref_f32 = reference_forward((encoded, other), params, quantize_like_kernel=False)
    assert jnp.allclose(out, ref_f32, atol=0.1), "bf16 quantization error exceeds budget vs f32 reference"

    assert jnp.allclose(jnp.sum(out, axis=1), 1.0, atol=1e-5), "softmax rows must sum to 1"

    print("KERNEL_OK")
</pallas_src>

<mosaic_0001>
module attributes {stable_mosaic.version = 11 : i64} {
  func.func @kernel(%arg0: i32, %arg1: memref<16x3136xbf16, #tpu.memory_space<vmem>>, %arg2: memref<16x3136xbf16, #tpu.memory_space<vmem>>, %arg3: memref<48x128xf32, #tpu.memory_space<vmem>>, %arg4: memref<32x10xf32, #tpu.memory_space<vmem>>, %arg5: memref<32x16xf32, #tpu.memory_space<vmem>>, %arg6: memref<2x16xf32, #tpu.memory_space<vmem>>) attributes {dimension_semantics = [#tpu.dimension_semantics<arbitrary>], iteration_bounds = array<i64: 2>, scalar_prefetch = 0 : i64, scratch_operands = 2 : i64, tpu.core_type = #tpu.core_type<tc>, window_params = [{transform_indices = @transform_0, window_bounds = array<i64: 16, 3136>}, {pipeline_mode = #tpu.pipeline_mode<synchronous>, transform_indices = @transform_1, window_bounds = array<i64: 16, 3136>}, {pipeline_mode = #tpu.pipeline_mode<synchronous>, transform_indices = @transform_2, window_bounds = array<i64: 48, 128>}, {pipeline_mode = #tpu.pipeline_mode<synchronous>, transform_indices = @transform_3, window_bounds = array<i64: 32, 10>}]} {
    %c0_i32 = arith.constant 0 : i32
    %0 = arith.cmpi eq, %arg0, %c0_i32 : i32
    %1 = arith.extui %0 : i1 to i32
    %c0_i32_0 = arith.constant 0 : i32
    %2 = arith.cmpi ne, %1, %c0_i32_0 : i32
    scf.if %2 {
      %cst_15 = arith.constant 0.000000e+00 : f32
      %24 = vector.broadcast %cst_15 : f32 to vector<2x16xf32>
      %c0_16 = arith.constant 0 : index
      %c0_17 = arith.constant 0 : index
      %25 = vector.load %arg6[%c0_16, %c0_17] : memref<2x16xf32, #tpu.memory_space<vmem>>, vector<2x16xf32>
      tpu.vector_store %arg6[%c0_16, %c0_17], %24 {strides = array<i32>} : memref<2x16xf32, #tpu.memory_space<vmem>>, vector<2x16xf32>,
    } else {
    }
    %c0 = arith.constant 0 : index
    %c0_1 = arith.constant 0 : index
    %3 = vector.load %arg1[%c0, %c0_1] : memref<16x3136xbf16, #tpu.memory_space<vmem>>, vector<16x3136xbf16>
    %c0_2 = arith.constant 0 : index
    %c0_3 = arith.constant 0 : index
    %4 = vector.load %arg2[%c0_2, %c0_3] : memref<16x3136xbf16, #tpu.memory_space<vmem>>, vector<16x3136xbf16>
    %cst = arith.constant dense<0.000000e+00> : vector<16x16xf32>
    %5 = tpu.matmul %3, %4, %cst {dimension_numbers = #tpu.dot_dimension_numbers<[1], [1], [0], [0], [0, 0, 1, 0], [], []>} : vector<16x3136xbf16>, vector<16x3136xbf16>, vector<16x16xf32> -> vector<16x16xf32>
    %c16_i32 = arith.constant 16 : i32
    %6 = arith.muli %arg0, %c16_i32 : i32
    %7 = tpu.assume_multiple %6, 16 : i32
    %8 = arith.index_cast %7 : i32 to index
    %c0_4 = arith.constant 0 : index
    %9 = vector.load %arg5[%8, %c0_4] : memref<32x16xf32, #tpu.memory_space<vmem>>, vector<16x16xf32>
    tpu.vector_store %arg5[%8, %c0_4], %5 {strides = array<i32>} : memref<32x16xf32, #tpu.memory_space<vmem>>, vector<16x16xf32>,
    %c0_5 = arith.constant 0 : index
    %c0_6 = arith.constant 0 : index
    %10 = vector.load %arg6[%c0_5, %c0_6] : memref<2x16xf32, #tpu.memory_space<vmem>>, vector<1x16xf32>
    %cst_7 = arith.constant dense<0.000000e+00> : vector<16xf32>
    %11 = vector.multi_reduction <add>, %5, %cst_7 [0] : vector<16x16xf32> to vector<16xf32>
    %12 = vector.shape_cast %11 : vector<16xf32> to vector<1x16xf32>
    %13 = arith.addf %10, %12 : vector<1x16xf32>
    %c0_8 = arith.constant 0 : index
    %c0_9 = arith.constant 0 : index
    %14 = vector.load %arg6[%c0_8, %c0_9] : memref<2x16xf32, #tpu.memory_space<vmem>>, vector<1x16xf32>
    tpu.vector_store %arg6[%c0_8, %c0_9], %13 {strides = array<i32>} : memref<2x16xf32, #tpu.memory_space<vmem>>, vector<1x16xf32>,
    %c1 = arith.constant 1 : index
    %c0_10 = arith.constant 0 : index
    %15 = vector.load %arg6[%c1, %c0_10] : memref<2x16xf32, #tpu.memory_space<vmem>>, vector<1x16xf32>
    %16 = arith.mulf %5, %5 : vector<16x16xf32>
    %cst_11 = arith.constant dense<0.000000e+00> : vector<16xf32>
    %17 = vector.multi_reduction <add>, %16, %cst_11 [0] : vector<16x16xf32> to vector<16xf32>
    %18 = vector.shape_cast %17 : vector<16xf32> to vector<1x16xf32>
    %19 = arith.addf %15, %18 : vector<1x16xf32>
    %c1_12 = arith.constant 1 : index
    %c0_13 = arith.constant 0 : index
    %20 = vector.load %arg6[%c1_12, %c0_13] : memref<2x16xf32, #tpu.memory_space<vmem>>, vector<1x16xf32>
    tpu.vector_store %arg6[%c1_12, %c0_13], %19 {strides = array<i32>} : memref<2x16xf32, #tpu.memory_space<vmem>>, vector<1x16xf32>,
    %c1_i32 = arith.constant 1 : i32
    %21 = arith.cmpi eq, %arg0, %c1_i32 : i32
    %22 = arith.extui %21 : i1 to i32
    %c0_i32_14 = arith.constant 0 : i32
    %23 = arith.cmpi ne, %22, %c0_i32_14 : i32
    scf.if %23 {
      %c0_15 = arith.constant 0 : index
      %c0_16 = arith.constant 0 : index
      %24 = vector.load %arg3[%c0_15, %c0_16] : memref<48x128xf32, #tpu.memory_space<vmem>>, vector<48x128xf32>
      %25 = vector.extract_strided_slice %24 {offsets = [0, 0], sizes = [16, 10], strides = [1, 1]} : vector<48x128xf32> to vector<16x10xf32>
      %26 = vector.extract_strided_slice %24 {offsets = [16, 0], sizes = [10, 10], strides = [1, 1]} : vector<48x128xf32> to vector<10x10xf32>
      %27 = vector.extract_strided_slice %24 {offsets = [32, 0], sizes = [1, 16], strides = [1, 1]} : vector<48x128xf32> to vector<1x16xf32>
      %28 = vector.extract_strided_slice %24 {offsets = [33, 0], sizes = [1, 16], strides = [1, 1]} : vector<48x128xf32> to vector<1x16xf32>
      %29 = vector.extract_strided_slice %24 {offsets = [34, 0], sizes = [1, 10], strides = [1, 1]} : vector<48x128xf32> to vector<1x10xf32>
      %30 = vector.extract_strided_slice %24 {offsets = [35, 0], sizes = [1, 10], strides = [1, 1]} : vector<48x128xf32> to vector<1x10xf32>
      %31 = vector.extract_strided_slice %24 {offsets = [36, 0], sizes = [1, 10], strides = [1, 1]} : vector<48x128xf32> to vector<1x10xf32>
      %32 = vector.extract_strided_slice %24 {offsets = [37, 0], sizes = [1, 10], strides = [1, 1]} : vector<48x128xf32> to vector<1x10xf32>
      %33 = tpu.iota {dimensions = array<i32: 0>} : vector<32x1xi32>
      %c24_i32 = arith.constant 24 : i32
      %34 = vector.broadcast %c24_i32 : i32 to vector<32x1xi32>
      %35 = arith.cmpi slt, %33, %34 : vector<32x1xi32>
      %36 = arith.extui %35 : vector<32x1xi1> to vector<32x1xi32>
      %37 = arith.sitofp %36 : vector<32x1xi32> to vector<32x1xf32>
      %c0_17 = arith.constant 0 : index
      %c0_18 = arith.constant 0 : index
      %38 = vector.load %arg5[%c0_17, %c0_18] : memref<32x16xf32, #tpu.memory_space<vmem>>, vector<32x16xf32>
      %c0_19 = arith.constant 0 : index
      %c0_20 = arith.constant 0 : index
      %39 = vector.load %arg6[%c0_19, %c0_20] : memref<2x16xf32, #tpu.memory_space<vmem>>, vector<1x16xf32>
      %cst_21 = arith.constant 0.0416666679 : f32
      %40 = vector.broadcast %cst_21 : f32 to vector<1x16xf32>
      %41 = arith.mulf %39, %40 : vector<1x16xf32>
      %c1_22 = arith.constant 1 : index
      %c0_23 = arith.constant 0 : index
      %42 = vector.load %arg6[%c1_22, %c0_23] : memref<2x16xf32, #tpu.memory_space<vmem>>, vector<1x16xf32>
      %cst_24 = arith.constant 0.0416666679 : f32
      %43 = vector.broadcast %cst_24 : f32 to vector<1x16xf32>
      %44 = arith.mulf %42, %43 : vector<1x16xf32>
      %45 = arith.mulf %41, %41 : vector<1x16xf32>
      %46 = arith.subf %44, %45 : vector<1x16xf32>
      %47 = vector.broadcast %41 : vector<1x16xf32> to vector<32x16xf32>
      %48 = arith.subf %38, %47 : vector<32x16xf32>
      %cst_25 = arith.constant 9.99999974E-6 : f32
      %49 = vector.broadcast %cst_25 : f32 to vector<1x16xf32>
      %50 = arith.addf %46, %49 : vector<1x16xf32>
      %51 = math.rsqrt %50 : vector<1x16xf32>
      %52 = vector.broadcast %51 : vector<1x16xf32> to vector<32x16xf32>
      %53 = arith.mulf %48, %52 : vector<32x16xf32>
      %54 = vector.broadcast %27 : vector<1x16xf32> to vector<32x16xf32>
      %55 = arith.mulf %53, %54 : vector<32x16xf32>
      %56 = vector.broadcast %28 : vector<1x16xf32> to vector<32x16xf32>
      %57 = arith.addf %55, %56 : vector<32x16xf32>
      %cst_26 = arith.constant 0.000000e+00 : f32
      %58 = vector.broadcast %cst_26 : f32 to vector<32x16xf32>
      %59 = arith.maximumf %57, %58 : vector<32x16xf32>
      %cst_27 = arith.constant dense<0.000000e+00> : vector<32x10xf32>
      %60 = tpu.matmul %59, %25, %cst_27 {dimension_numbers = #tpu.dot_dimension_numbers<[1], [0], [0], [1], [0, 0, 1, 1], [], []>} : vector<32x16xf32>, vector<16x10xf32>, vector<32x10xf32> -> vector<32x10xf32>
      %61 = vector.broadcast %37 : vector<32x1xf32> to vector<32x10xf32>
      %62 = arith.mulf %60, %61 : vector<32x10xf32>
      %cst_28 = arith.constant dense<0.000000e+00> : vector<10xf32>
      %63 = vector.multi_reduction <add>, %62, %cst_28 [0] : vector<32x10xf32> to vector<10xf32>
      %64 = vector.shape_cast %63 : vector<10xf32> to vector<1x10xf32>
      %cst_29 = arith.constant 0.0416666679 : f32
      %65 = vector.broadcast %cst_29 : f32 to vector<1x10xf32>
      %66 = arith.mulf %64, %65 : vector<1x10xf32>
      %67 = arith.mulf %62, %62 : vector<32x10xf32>
      %cst_30 = arith.constant dense<0.000000e+00> : vector<10xf32>
      %68 = vector.multi_reduction <add>, %67, %cst_30 [0] : vector<32x10xf32> to vector<10xf32>
      %69 = vector.shape_cast %68 : vector<10xf32> to vector<1x10xf32>
      %cst_31 = arith.constant 0.0416666679 : f32
      %70 = vector.broadcast %cst_31 : f32 to vector<1x10xf32>
      %71 = arith.mulf %69, %70 : vector<1x10xf32>
      %72 = arith.mulf %66, %66 : vector<1x10xf32>
      %73 = arith.subf %71, %72 : vector<1x10xf32>
      %74 = vector.broadcast %66 : vector<1x10xf32> to vector<32x10xf32>
      %75 = arith.subf %60, %74 : vector<32x10xf32>
      %cst_32 = arith.constant 9.99999974E-6 : f32
      %76 = vector.broadcast %cst_32 : f32 to vector<1x10xf32>
      %77 = arith.addf %73, %76 : vector<1x10xf32>
      %78 = math.rsqrt %77 : vector<1x10xf32>
      %79 = vector.broadcast %78 : vector<1x10xf32> to vector<32x10xf32>
      %80 = arith.mulf %75, %79 : vector<32x10xf32>
      %81 = vector.broadcast %29 : vector<1x10xf32> to vector<32x10xf32>
      %82 = arith.mulf %80, %81 : vector<32x10xf32>
      %83 = vector.broadcast %30 : vector<1x10xf32> to vector<32x10xf32>
      %84 = arith.addf %82, %83 : vector<32x10xf32>
      %cst_33 = arith.constant 0.000000e+00 : f32
      %85 = vector.broadcast %cst_33 : f32 to vector<32x10xf32>
      %86 = arith.maximumf %84, %85 : vector<32x10xf32>
      %cst_34 = arith.constant dense<0.000000e+00> : vector<32x10xf32>
      %87 = tpu.matmul %86, %26, %cst_34 {dimension_numbers = #tpu.dot_dimension_numbers<[1], [0], [0], [1], [0, 0, 1, 1], [], []>} : vector<32x10xf32>, vector<10x10xf32>, vector<32x10xf32> -> vector<32x10xf32>
      %88 = vector.broadcast %37 : vector<32x1xf32> to vector<32x10xf32>
      %89 = arith.mulf %87, %88 : vector<32x10xf32>
      %cst_35 = arith.constant dense<0.000000e+00> : vector<10xf32>
      %90 = vector.multi_reduction <add>, %89, %cst_35 [0] : vector<32x10xf32> to vector<10xf32>
      %91 = vector.shape_cast %90 : vector<10xf32> to vector<1x10xf32>
      %cst_36 = arith.constant 0.0416666679 : f32
      %92 = vector.broadcast %cst_36 : f32 to vector<1x10xf32>
      %93 = arith.mulf %91, %92 : vector<1x10xf32>
      %94 = arith.mulf %89, %89 : vector<32x10xf32>
      %cst_37 = arith.constant dense<0.000000e+00> : vector<10xf32>
      %95 = vector.multi_reduction <add>, %94, %cst_37 [0] : vector<32x10xf32> to vector<10xf32>
      %96 = vector.shape_cast %95 : vector<10xf32> to vector<1x10xf32>
      %cst_38 = arith.constant 0.0416666679 : f32
      %97 = vector.broadcast %cst_38 : f32 to vector<1x10xf32>
      %98 = arith.mulf %96, %97 : vector<1x10xf32>
      %99 = arith.mulf %93, %93 : vector<1x10xf32>
      %100 = arith.subf %98, %99 : vector<1x10xf32>
      %101 = vector.broadcast %93 : vector<1x10xf32> to vector<32x10xf32>
      %102 = arith.subf %87, %101 : vector<32x10xf32>
      %cst_39 = arith.constant 9.99999974E-6 : f32
      %103 = vector.broadcast %cst_39 : f32 to vector<1x10xf32>
      %104 = arith.addf %100, %103 : vector<1x10xf32>
      %105 = math.rsqrt %104 : vector<1x10xf32>
      %106 = vector.broadcast %105 : vector<1x10xf32> to vector<32x10xf32>
      %107 = arith.mulf %102, %106 : vector<32x10xf32>
      %108 = vector.broadcast %31 : vector<1x10xf32> to vector<32x10xf32>
      %109 = arith.mulf %107, %108 : vector<32x10xf32>
      %110 = vector.broadcast %32 : vector<1x10xf32> to vector<32x10xf32>
      %111 = arith.addf %109, %110 : vector<32x10xf32>
      %cst_40 = arith.constant dense<0xFF800000> : vector<32xf32>
      %112 = vector.multi_reduction <maximumf>, %111, %cst_40 [1] : vector<32x10xf32> to vector<32xf32>
      %113 = vector.shape_cast %112 : vector<32xf32> to vector<32x1xf32>
      %114 = vector.broadcast %113 : vector<32x1xf32> to vector<32x10xf32>
      %115 = arith.subf %111, %114 : vector<32x10xf32>
      %116 = math.exp %115 : vector<32x10xf32>
      %cst_41 = arith.constant dense<0.000000e+00> : vector<32xf32>
      %117 = vector.multi_reduction <add>, %116, %cst_41 [1] : vector<32x10xf32> to vector<32xf32>
      %118 = vector.shape_cast %117 : vector<32xf32> to vector<32x1xf32>
      %119 = tpu.reciprocal %118 : vector<32x1xf32> -> vector<32x1xf32>
      %120 = vector.broadcast %119 : vector<32x1xf32> to vector<32x10xf32>
      %121 = arith.mulf %116, %120 : vector<32x10xf32>
      %c0_42 = arith.constant 0 : index
      %c0_43 = arith.constant 0 : index
      %122 = vector.load %arg4[%c0_42, %c0_43] : memref<32x10xf32, #tpu.memory_space<vmem>>, vector<32x10xf32>
      tpu.vector_store %arg4[%c0_42, %c0_43], %121 {strides = array<i32>} : memref<32x10xf32, #tpu.memory_space<vmem>>, vector<32x10xf32>,
    } else {
    }
    return
  }
  func.func @transform_0(%arg0: i32) -> (i32, i32) {
    %c0_i32 = arith.constant 0 : i32
    %c0_i32_0 = arith.constant 0 : i32
    return %arg0, %c0_i32 : i32, i32
  }
  func.func @transform_1(%arg0: i32) -> (i32, i32) {
    %c0_i32 = arith.constant 0 : i32
    %c0_i32_0 = arith.constant 0 : i32
    %c0_i32_1 = arith.constant 0 : i32
    return %c0_i32, %c0_i32_0 : i32, i32
  }
  func.func @transform_2(%arg0: i32) -> (i32, i32) {
    %c0_i32 = arith.constant 0 : i32
    %c0_i32_0 = arith.constant 0 : i32
    %c0_i32_1 = arith.constant 0 : i32
    return %c0_i32, %c0_i32_0 : i32, i32
  }
  func.func @transform_3(%arg0: i32) -> (i32, i32) {
    %c0_i32 = arith.constant 0 : i32
    %c0_i32_0 = arith.constant 0 : i32
    %c0_i32_1 = arith.constant 0 : i32
    return %c0_i32, %c0_i32_0 : i32, i32
  }
}

</mosaic_0001>

<bundles_post_ra>
// kernel: tpu_custom_call.1
= control target key start
LH: loop header
LB: loop body
LE: loop exit
PB: predicated region body
PF: predicated region fallthrough
CT: control target
= control target key end

     0   :  { %8 = vsyncpa [#allocation5], 0  ;;  %s2273_s0 = inlined_call_operand.hbm [shape: bf16[32,3136], index: 0, kind: input, shape index: {}]   ;;  %s2274_s1 = inlined_call_operand.hbm [shape: bf16[16,3136], index: 1, kind: input, shape index: {}]   ;;  %s2275_s2 = inlined_call_operand.hbm [shape: f32[48,128], index: 2, kind: input, shape index: {}]   ;;  %s2276_s3 = inlined_call_operand.vmem [shape: f32[32,10], index: 3, kind: output, shape index: {}]  }
   0x1   :  { %10 = vsyncpa [#allocation5 + $0x1], 0 }
   0x2   :  { %11 = vsyncpa [#allocation7], 0  ;;  %s2033_s12 = smov 0   ;;  %s2035_s13 = smov 0  }
   0x3   :  { %s2037_s14 = smov 0   ;;  %s2039_s15 = smov 0  }
   0x4 LB: > { %s2052_s16 = sadd.s32 4294967295, %s2001_s15   ;;  %p37_p0 = scmp.ne.s32.totalorder %s1993_s13, %s1989_s12  ;;  %s2001_s15 = sphi %s2039_s15, %s2292_s15   ;;  %s1997_s14 = sphi %s2037_s14, %s2291_s14   ;;  %s1993_s13 = sphi %s2035_s13, %s2290_s13   ;;  %s1989_s12 = sphi %s2033_s12, %s2289_s12  }
   0x5   : > { %p2277_p1 = scmp.eq.s32.totalorder %s2052_s16, 0  ;;  %p1602_p2 = scmp.ge.s32.totalorder %s2001_s15, 1 }
   0x6   : > { %p111_p3 = scmp.lt.s32.totalorder %s2001_s15, 3  ;;  %s2003_s19 = smov [#allocation6]  }
   0x7   : > { %p2061_p5 = por %p2277_p1, %p37_p0  ;;  %s123_s20 = sshll.u32 %s2003_s19, 4  ;;  %s124_s20 = int_to_ptr.vmem [resolvable:$true] %s123_s20 }
   0x8   : > { %p2065_p6 = pnand %p1602_p2, %p111_p3  ;;  %s2004_s22 = smov [#allocation8]  }
   0x9   : > { %s2280_s17 = scalar_select %p2061_p5, 1, 0 }
   0xa   : > { %s2281_s18 = scalar_select %p2065_p6, 1, 0 }
   0xb   : > { %p1730_p7 = pneg %p2065_p6  ;;  %s136_s23 = sshll.u32 %s2004_s22, 4  ;;  %s137_s23 = int_to_ptr.vmem [resolvable:$true] %s136_s23 }
   0xc   : > { %s1894_s24 = scalar_lea.vmem %s124_s20, 3200  ;;  %p1902_p13 = scmp.lt.s32.totalorder %s124_s20, %s124_s20 }
   0xd   : > { %p2073_p8 = pnand %p1730_p7, %p2277_p1  ;;  %p1895_p10 = scmp.ne.s32.totalorder %s124_s20, %s1894_s24 }
   0xe   : > { %p1903_p0 = scmp.lt.s32.totalorder %s1894_s24, %s1894_s24 }
   0xf   : > { %p1885_p9 = pneg %p2073_p8 }
  0x10   : > { %p1904_p2 = por %p1903_p0, %p1902_p13 }
  0x11   : > { %p1897_p11 = pnand %p1895_p10, %p1885_p9 }
  0x13   : > { %p1898_p12 = pneg %p1897_p11 }
  0x15   : > { %p1905_p3 = pnand %p1904_p2, %p1898_p12 }
  0x17   : > { %1908 = shalt.err (!%p1905_p3)
}
  0x18   : > { %s2005_s25 = smov 1600   ;;  %s2006_s26 = smov 100  }
  0x19   : > { %1733 = dma.hbm_to_vmem [thread:$0]  (!%p2073_p8), %s2274_s1, 3200, %s124_s20, [#allocation7], %s2005_s25, %s2005_s25, %s2006_s26  }
  0x1a   : > { %s1920_s29 = scalar_lea.vmem %s137_s23, 768  ;;  %p1928_p12 = scmp.lt.s32.totalorder %s137_s23, %s137_s23 }
  0x1b   : > { %p1921_p7 = scmp.ne.s32.totalorder %s137_s23, %s1920_s29  ;;  %p1929_p13 = scmp.lt.s32.totalorder %s1920_s29, %s1920_s29 }
  0x1d   : > { %p1923_p10 = pnand %p1921_p7, %p1885_p9  ;;  %p1930_p0 = por %p1929_p13, %p1928_p12 }
  0x1f   : > { %p1924_p11 = pneg %p1923_p10 }
  0x21   : > { %p1931_p2 = pnand %p1930_p0, %p1924_p11 }
  0x23   : > { %1934 = shalt.err (!%p1931_p2)
}
  0x24   : > { %s2007_s30 = smov 128   ;;  %s2008_s4 = smov 8  }
  0x25   : > { %1736 = dma.hbm_to_vmem [thread:$0]  (!%p2073_p8), %s2275_s2, 768, %s137_s23, [#allocation7], %s2007_s30, %s2007_s30, %s2008_s4  }
  0x26   : > { %s2099_s7 = sadd.s32 1, %s2001_s15   ;;  %s24_s9 = sadd.s32 1, %s1997_s14 }
  0x27   : > { %s21_s8 = ssub.s32 %s2001_s15, %s2099_s7  ;;  %p31_p3 = scmp.ne.s32.totalorder %s1997_s14, %s1993_s13 }
  0x28   : > { %p22_p9 = scmp.eq.s32.totalorder %s21_s8, 0  ;;  %p32_p7 = scmp.eq.s32.totalorder %s2001_s15, 0 }
  0x29   : > { %p1743_p11 = scmp.lt.s32.totalorder %s2001_s15, 2  ;;  %s150_s11 = sand.u32 1, %s1997_s14  }
  0x2a   : > { %s2108_s10 = scalar_select %p22_p9, %s1997_s14, %s24_s9  }
  0x2b   : > { %p33_p10 = por %p32_p7, %p31_p3  ;;  %s1718_s12 = smul.u32 3200, %s2001_s15 }
  0x2c   : > { %s1717_s19 = smul.u32 200, %s150_s11  ;;  %s2124_s28 = scalar_lea.sflag [#allocation5], %s150_s11 }
  0x2d   : > { %p2113_p12 = pnand %p1743_p11, %p33_p10  ;;  %s2120_s23 = scalar_lea.hbm %s2273_s0, %s1718_s12 }
  0x2e   : > { %s154_s24 = scalar_lea.vmem [#allocation4], %s1717_s19  ;;  %s1935_s15 = scalar_lea.hbm %s2120_s23, 3200 }
  0x2f   : > { %s162_s27 = sshll.u32 %s154_s24, 4  ;;  %p1936_p8 = scmp.ne.s32.totalorder %s2120_s23, %s1935_s15  ;;  %s2122_s27 = int_to_ptr.vmem [resolvable:$true] %s162_s27 }
  0x30   : > { %p1937_p13 = pneg %p2113_p12  ;;  %s1940_s4 = scalar_lea.hbm %s2273_s0, 6400 }
  0x31   : > { %p1941_p9 = scmp.lt.s32.totalorder %s2120_s23, %s2273_s0  ;;  %p1942_p3 = scmp.lt.s32.totalorder %s1940_s4, %s1935_s15 }
  0x32   : > { %p1938_p0 = pnand %p1937_p13, %p1936_p8 }
  0x33   : > { %p1943_p7 = por %p1942_p3, %p1941_p9 }
  0x34   : > { %p1939_p2 = pneg %p1938_p0 }
  0x36   : > { %p1944_p10 = pnand %p1943_p7, %p1939_p2 }
  0x38   : > { %1947 = shalt.err (!%p1944_p10)
}
  0x39   : > { %s1948_s8 = scalar_lea.vmem %s2122_s27, 3200  ;;  %s2009_s9 = smov [#allocation4]  }
  0x3a   : > { %p1949_p11 = scmp.ne.s32.totalorder %s2122_s27, %s1948_s8  ;;  %s1953_s11 = sshll.u32 %s2009_s9, 4  ;;  %s1954_s11 = int_to_ptr.vmem [resolvable:$false] %s1953_s11 }
  0x3b   : > { %s1955_s12 = scalar_lea.vmem %s1954_s11, 6400  ;;  %p1956_p0 = scmp.lt.s32.totalorder %s2122_s27, %s1954_s11 }
  0x3c   : > { %p1951_p4 = pnand %p1949_p11, %p1937_p13  ;;  %p1957_p1 = scmp.lt.s32.totalorder %s1955_s12, %s1948_s8 }
  0x3e   : > { %p1952_p8 = pneg %p1951_p4  ;;  %p1958_p5 = por %p1957_p1, %p1956_p0 }
  0x40   : > { %p1959_p6 = pnand %p1958_p5, %p1952_p8 }
  0x42   : > { %1962 = shalt.err (!%p1959_p6)
}
  0x43   : > { %1740 = dma.hbm_to_vmem [thread:$0]  (!%p2113_p12), %s2120_s23, 3200, %s2122_s27, %s2124_s28, %s2005_s25, %s2005_s25, %s2006_s26  }
  0x44   : > { %p2284_p4 = scmp.ne.s32.totalorder %s2281_s18, 0 }
  0x45   : > { %s176_s19 = sand.u32 (!%p2284_p4), 1, %s1993_s13   ;;  %p2285_p1 = scmp.ne.s32.totalorder (!%p2284_p4), %s2280_s17, 0 }
  0x46   : > { %174 = sbr.rel (%p2284_p4) target bundleno = 1214 (0x4be), region = 32  ;;  %s177_s22 = scalar_lea.sflag (!%p2284_p4), [#allocation5], %s176_s19 }
  0x47   : > { %s1719_s21 = smul.u32 (!%p2284_p4), 200, %s176_s19 }
  0x49   : > { %s2151_s24 = scalar_lea.vmem (!%p2284_p4), [#allocation4], %s1719_s21 }
  0x4b   : > { %1980 = dma.done.wait (%p2285_p1), %s177_s22, 3200  }
  0x4c   : > { %1982 = vsyncadd (%p2285_p1), %s177_s22, 4294964096  ;;  %p2286_p5 = scmp.eq.s32.totalorder %s2052_s16, 0 }
  0x4e   : > { %1984 = dma.done.wait (%p2286_p5), [#allocation7], 3968   ;;  %p2287_p6 = pmov %p2286_p5 }
  0x4f   : > { %p2288_p12 = scmp.ne.s32.totalorder %s2052_s16, 0 }
  0x50   : > { %1986 = vsyncadd (%p2287_p6), [#allocation7], 4294963328 }
  0x51   : > { %211 = sbr.rel (%p2288_p12) target bundleno = 88 (0x58), region = 48 }
  0x56   : > { %vm212_vm0 = vcmask 123904   ;;  %v2010_v0 = vmov 0.0  }
  0x57   : > { %213 = vst.msk [vmem:[#allocation3] sm:$0x3] %vm212_vm0, %v2010_v0 }
  0x58 PF: > { %v1787_v1 = vld [vmem:[#allocation6 + $0x4] ss:$100 sps:$4 sm:$0xff]   ;;  %v1789_v2 = vld [vmem:[#allocation6 + $0xc] ss:$100 sps:$4 sm:$0xff]   ;;  %v1795_v5 = vld [vmem:[%s2151_s24 + $0x4] ss:$100 sps:$4 sm:$0xff]  }
  0x59   : > { %537 = vmatprep.subr.bf16.mxu0 %v1787_v1  ;;  %v1791_v3 = vld [vmem:[#allocation6] ss:$100 sps:$4 sm:$0xff]   ;;  %v1792_v4 = vld [vmem:[#allocation6 + $0x8] ss:$100 sps:$4 sm:$0xff]   ;;  %578 = vmatprep.subr.bf16.mxu1 %v1789_v2  ;;  %v1793_v6 = vld [vmem:[%s2151_s24] ss:$100 sps:$4 sm:$0xff]  }
  0x5a   : > { %538 = vmatpush1.bf16.xpose.msra.mxu0 %v1791_v3  ;;  %579 = vmatpush1.bf16.xpose.msra.mxu1 %v1792_v4  ;;  %v1798_v7 = vld [vmem:[%s2151_s24 + $0xc] ss:$100 sps:$4 sm:$0xff]   ;;  %v1801_v9 = vld [vmem:[#allocation6 + $0x14] ss:$100 sps:$4 sm:$0xff]   ;;  %v1807_v13 = vld [vmem:[%s2151_s24 + $0x14] ss:$100 sps:$4 sm:$0xff]  }
  0x5b   : > { %555 = vmatprep.mubr.bf16.mxu0 %v1795_v5  ;;  %v1796_v8 = vld [vmem:[%s2151_s24 + $0x8] ss:$100 sps:$4 sm:$0xff]   ;;  %596 = vmatprep.mubr.bf16.mxu1 %v1798_v7  ;;  %v1799_v10 = vld [vmem:[#allocation6 + $0x10] ss:$100 sps:$4 sm:$0xff]   ;;  %v1805_v17 = vld [vmem:[%s2151_s24 + $0x10] ss:$100 sps:$4 sm:$0xff]  }
  0x5c   : > { %v1804_v11 = vld [vmem:[#allocation6 + $0x1c] ss:$100 sps:$4 sm:$0xff]   ;;  %619 = vmatprep.subr.bf16.mxu0 %v1801_v9  ;;  %v1810_v14 = vld [vmem:[%s2151_s24 + $0x1c] ss:$100 sps:$4 sm:$0xff]   ;;  %v1813_v15 = vld [vmem:[#allocation6 + $0x24] ss:$100 sps:$4 sm:$0xff]  }
  0x5d   : > { %v1802_v12 = vld [vmem:[#allocation6 + $0x18] ss:$100 sps:$4 sm:$0xff]   ;;  %660 = vmatprep.subr.bf16.mxu1 %v1804_v11  ;;  %v1816_v16 = vld [vmem:[#allocation6 + $0x2c] ss:$100 sps:$4 sm:$0xff]   ;;  %v1811_v19 = vld [vmem:[#allocation6 + $0x20] ss:$100 sps:$4 sm:$0xff]  }
  0x5e   : > { %v1808_v18 = vld [vmem:[%s2151_s24 + $0x18] ss:$100 sps:$4 sm:$0xff]   ;;  %v1819_v21 = vld [vmem:[%s2151_s24 + $0x24] ss:$100 sps:$4 sm:$0xff]   ;;  %v1822_v22 = vld [vmem:[%s2151_s24 + $0x2c] ss:$100 sps:$4 sm:$0xff]  }
  0x5f   : > { %v1814_v20 = vld [vmem:[#allocation6 + $0x28] ss:$100 sps:$4 sm:$0xff]   ;;  %v1825_v23 = vld [vmem:[#allocation6 + $0x34] ss:$100 sps:$4 sm:$0xff]   ;;  %v1828_v24 = vld [vmem:[#allocation6 + $0x3c] ss:$100 sps:$4 sm:$0xff]  }
  0x60   : > { %v1817_v25 = vld [vmem:[%s2151_s24 + $0x20] ss:$100 sps:$4 sm:$0xff]   ;;  %v1820_v26 = vld [vmem:[%s2151_s24 + $0x28] ss:$100 sps:$4 sm:$0xff]   ;;  %v1831_v29 = vld [vmem:[%s2151_s24 + $0x34] ss:$100 sps:$4 sm:$0xff]  }
  0x61   : > { %556 = vmatmul.mubr.bf16.vlgmr.msra.gmra.mxu0 %v1793_v6  ;;  %597 = vmatmul.mubr.bf16.vlgmr.msra.gmra.mxu1 %v1796_v8  ;;  %v1823_v27 = vld [vmem:[#allocation6 + $0x30] ss:$100 sps:$4 sm:$0xff]   ;;  %v1826_v28 = vld [vmem:[#allocation6 + $0x38] ss:$100 sps:$4 sm:$0xff]   ;;  %v1837_v31 = vld [vmem:[#allocation6 + $0x44] ss:$100 sps:$4 sm:$0xff]  }
  0x62   : > { %620 = vmatpush1.bf16.xpose.msra.mxu0 %v1799_v10  ;;  %661 = vmatpush1.bf16.xpose.msra.mxu1 %v1802_v12  ;;  %v1834_v30 = vld [vmem:[%s2151_s24 + $0x3c] ss:$100 sps:$4 sm:$0xff]   ;;  %v1829_v33 = vld [vmem:[%s2151_s24 + $0x30] ss:$100 sps:$4 sm:$0xff]   ;;  %v1843_v37 = vld [vmem:[%s2151_s24 + $0x44] ss:$100 sps:$4 sm:$0xff]  }
  0x63   : > { %637 = vmatprep.mubr.bf16.mxu0 %v1807_v13  ;;  %678 = vmatprep.mubr.bf16.mxu1 %v1810_v14  ;;  %v1840_v32 = vld [vmem:[#allocation6 + $0x4c] ss:$100 sps:$4 sm:$0xff]   ;;  %v1835_v35 = vld [vmem:[#allocation6 + $0x40] ss:$100 sps:$4 sm:$0xff]   ;;  %v1849_v39 = vld [vmem:[#allocation6 + $0x54] ss:$100 sps:$4 sm:$0xff]  }
  0x64   : > { %701 = vmatprep.subr.bf16.mxu0 %v1813_v15  ;;  %742 = vmatprep.subr.bf16.mxu1 %v1816_v16  ;;  %v1832_v34 = vld [vmem:[%s2151_s24 + $0x38] ss:$100 sps:$4 sm:$0xff]   ;;  %v1846_v38 = vld [vmem:[%s2151_s24 + $0x4c] ss:$100 sps:$4 sm:$0xff]   ;;  %v1841_v41 = vld [vmem:[%s2151_s24 + $0x40] ss:$100 sps:$4 sm:$0xff]  }
  0x65   : > { %v1838_v36 = vld [vmem:[#allocation6 + $0x48] ss:$100 sps:$4 sm:$0xff]   ;;  %v1852_v40 = vld [vmem:[#allocation6 + $0x5c] ss:$100 sps:$4 sm:$0xff]   ;;  %v1847_v43 = vld [vmem:[#allocation6 + $0x50] ss:$100 sps:$4 sm:$0xff]  }
  0x66   : > { %v1844_v42 = vld [vmem:[%s2151_s24 + $0x48] ss:$100 sps:$4 sm:$0xff]   ;;  %v1855_v45 = vld [vmem:[%s2151_s24 + $0x54] ss:$100 sps:$4 sm:$0xff]   ;;  %v1858_v46 = vld [vmem:[%s2151_s24 + $0x5c] ss:$100 sps:$4 sm:$0xff]  }
  0x67   : > { %v1850_v44 = vld [vmem:[#allocation6 + $0x58] ss:$100 sps:$4 sm:$0xff]   ;;  %v1859_v47 = vld [vmem:[#allocation6 + $0x60] ss:$100 sps:$4 sm:$0xff]   ;;  %v2011_v48 = vmov 0.0   ;;  %vm516_vm1 = vcmask 523264  }
  0x68   : > { %v1853_v49 = vld [vmem:[%s2151_s24 + $0x50] ss:$100 sps:$4 sm:$0xff]   ;;  %v1856_v50 = vld [vmem:[%s2151_s24 + $0x58] ss:$100 sps:$4 sm:$0xff]   ;;  %v521_v51 = vsel %vm516_vm1, %v1859_v47, 0  ;;  %vm2012_vm2 = vmmov 0  }
  0x69   : > { %638 = vmatmul.mubr.bf16.vlgmr.msra.gmra.mxu0 %v1805_v17  ;;  %679 = vmatmul.mubr.bf16.vlgmr.msra.gmra.mxu1 %v1808_v18  ;;  %v1860_v52 = vld [vmem:[%s2151_s24 + $0x60] ss:$100 sps:$4 sm:$0xff]   ;;  %s1664_s17 = sshll.u32 %s2052_s16, 4  ;;  %vm1058_vm3 = vcmask 130048   ;;  %vm1072_vm4 = vcmask 122880   ;;  %p1665_p13 = scmp.ne.s32.totalorder %s2052_s16, 1 }
  0x6a   : > { %702 = vmatpush1.bf16.xpose.msra.mxu0 %v1811_v19  ;;  %743 = vmatpush1.bf16.xpose.msra.mxu1 %v1814_v20  ;;  %s1057_s18 = scalar_lea.vmem [#allocation2], %s1664_s17 }
  0x6b   : > { %719 = vmatprep.mubr.bf16.mxu0 %v1819_v21  ;;  %760 = vmatprep.mubr.bf16.mxu1 %v1822_v22 }
  0x6c   : > { %783 = vmatprep.subr.bf16.mxu0 %v1825_v23  ;;  %824 = vmatprep.subr.bf16.mxu1 %v1828_v24 }
  0x71   : > { %720 = vmatmul.mubr.bf16.vlgmr.msra.gmra.mxu0 %v1817_v25  ;;  %761 = vmatmul.mubr.bf16.vlgmr.msra.gmra.mxu1 %v1820_v26 }
  0x72   : > { %784 = vmatpush1.bf16.xpose.msra.mxu0 %v1823_v27  ;;  %825 = vmatpush1.bf16.xpose.msra.mxu1 %v1826_v28 }
  0x73   : > { %801 = vmatprep.mubr.bf16.mxu0 %v1831_v29  ;;  %842 = vmatprep.mubr.bf16.mxu1 %v1834_v30 }
  0x74   : > { %865 = vmatprep.subr.bf16.mxu0 %v1837_v31  ;;  %906 = vmatprep.subr.bf16.mxu1 %v1840_v32 }
  0x79   : > { %802 = vmatmul.mubr.bf16.vlgmr.msra.gmra.mxu0 %v1829_v33  ;;  %843 = vmatmul.mubr.bf16.vlgmr.msra.gmra.mxu1 %v1832_v34 }
  0x7a   : > { %866 = vmatpush1.bf16.xpose.msra.mxu0 %v1835_v35  ;;  %907 = vmatpush1.bf16.xpose.msra.mxu1 %v1838_v36 }
  0x7b   : > { %883 = vmatprep.mubr.bf16.mxu0 %v1843_v37  ;;  %924 = vmatprep.mubr.bf16.mxu1 %v1846_v38 }
  0x7c   : > { %947 = vmatprep.subr.bf16.mxu0 %v1849_v39  ;;  %988 = vmatprep.subr.bf16.mxu1 %v1852_v40 }
  0x81   : > { %884 = vmatmul.mubr.bf16.vlgmr.msra.gmra.mxu0 %v1841_v41  ;;  %925 = vmatmul.mubr.bf16.vlgmr.msra.gmra.mxu1 %v1844_v42 }
  0x82   : > { %948 = vmatpush1.bf16.xpose.msra.mxu0 %v1847_v43  ;;  %989 = vmatpush1.bf16.xpose.msra.mxu1 %v1850_v44 }
  0x83   : > { %965 = vmatprep.mubr.bf16.mxu0 %v1855_v45  ;;  %1006 = vmatprep.mubr.bf16.mxu1 %v1858_v46 }
  0x84   : > { %1691 = vmatprep.subr.bf16.mxu0 %v2011_v48 }
  0x89   : > { %966 = vmatmul.mubr.bf16.vlgmr.msra.gmra.mxu0 %v1853_v49  ;;  %1007 = vmatmul.mubr.bf16.vlgmr.msra.gmra.mxu1 %v1856_v50 }
  0x8a   : > { %1692 = vmatpush3.bf16.xpose.msra.mxu0 %v521_v51  ;;  %1693 = vmatprep.mubr.msk.bf16.mxu0 %vm2012_vm2, %v2011_v48 }
  0x91   : > { %1694 = vmatmul.mubr.msk.bf16.vlgmr.msra.gmra.mxu0 %vm516_vm1, %v1860_v52 }
 0x121   : > { %v557_v53 = vpop.f32.mrf.mxu0  ;;  %v598_v54 = vpop.f32.mrf.mxu1 }
 0x122   : > { %v599_v7 = vadd.f32 %v598_v54, %v557_v53 }
 0x123   : > { %v559_v55 = vpop.f32.mrf.mxu0  ;;  %v600_v56 = vpop.f32.mrf.mxu1 }
 0x125   : > { %v560_v57 = vpop.f32.mrf.mxu0  ;;  %v601_v58 = vpop.f32.mrf.mxu1 }
 0x126   : > { %v602_v13 = vadd.f32 %v601_v58, %v560_v57 }
 0x127   : > { %v562_v59 = vpop.f32.mrf.mxu0  ;;  %v603_v60 = vpop.f32.mrf.mxu1 }
 0x129   : > { %v639_v61 = vpop.f32.mrf.mxu0  ;;  %v680_v62 = vpop.f32.mrf.mxu1 }
 0x12a   : > { %v640_v10 = vadd.f32 %v639_v61, %v599_v7 }
 0x12b   : > { %v641_v63 = vpop.f32.mrf.mxu0  ;;  %v682_v0 = vpop.f32.mrf.mxu1 }
 0x12c   : > { %v681_v16 = vadd.f32 %v680_v62, %v640_v10 }
 0x12d   : > { %v642_v1 = vpop.f32.mrf.mxu0  ;;  %v683_v2 = vpop.f32.mrf.mxu1 }
 0x12e   : > { %v643_v17 = vadd.f32 %v642_v1, %v602_v13 }
 0x12f   : > { %v644_v3 = vpop.f32.mrf.mxu0  ;;  %v685_v4 = vpop.f32.mrf.mxu1 }
 0x130   : > { %v684_v23 = vadd.f32 %v683_v2, %v643_v17 }
 0x131   : > { %v721_v5 = vpop.f32.mrf.mxu0  ;;  %v762_v6 = vpop.f32.mrf.mxu1 }
 0x132   : > { %v722_v20 = vadd.f32 %v721_v5, %v681_v16 }
 0x133   : > { %v723_v8 = vpop.f32.mrf.mxu0  ;;  %v764_v9 = vpop.f32.mrf.mxu1 }
 0x134   : > { %v763_v26 = vadd.f32 %v762_v6, %v722_v20 }
 0x135   : > { %v724_v11 = vpop.f32.mrf.mxu0  ;;  %v765_v12 = vpop.f32.mrf.mxu1 }
 0x136   : > { %v725_v27 = vadd.f32 %v724_v11, %v684_v23 }
 0x137   : > { %v726_v14 = vpop.f32.mrf.mxu0  ;;  %v767_v15 = vpop.f32.mrf.mxu1 }
 0x138   : > { %v766_v33 = vadd.f32 %v765_v12, %v725_v27 }
 0x139   : > { %v803_v18 = vpop.f32.mrf.mxu0  ;;  %v844_v19 = vpop.f32.mrf.mxu1 }
 0x13a   : > { %v804_v30 = vadd.f32 %v803_v18, %v763_v26  ;;  %v1061_v18 = vld [vmem:[#allocation3] sm:$0x1] }
 0x13b   : > { %v805_v21 = vpop.f32.mrf.mxu0  ;;  %v846_v22 = vpop.f32.mrf.mxu1 }
 0x13c   : > { %v845_v36 = vadd.f32 %v844_v19, %v804_v30  ;;  %v1074_v21 = vld [vmem:[#allocation3 + $0x1] sm:$0x1] }
 0x13d   : > { %v806_v24 = vpop.f32.mrf.mxu0  ;;  %v847_v25 = vpop.f32.mrf.mxu1 }
 0x13e   : > { %v807_v37 = vadd.f32 %v806_v24, %v766_v33 }
 0x13f   : > { %v808_v28 = vpop.f32.mrf.mxu0  ;;  %v849_v29 = vpop.f32.mrf.mxu1 }
 0x140   : > { %v848_v43 = vadd.f32 %v847_v25, %v807_v37 }
 0x141   : > { %v885_v31 = vpop.f32.mrf.mxu0  ;;  %v926_v32 = vpop.f32.mrf.mxu1 }
 0x142   : > { %v886_v40 = vadd.f32 %v885_v31, %v845_v36 }
 0x143   : > { %v887_v34 = vpop.f32.mrf.mxu0  ;;  %v928_v35 = vpop.f32.mrf.mxu1 }
 0x144   : > { %v927_v46 = vadd.f32 %v926_v32, %v886_v40 }
 0x145   : > { %v888_v38 = vpop.f32.mrf.mxu0  ;;  %v929_v39 = vpop.f32.mrf.mxu1 }
 0x146   : > { %v889_v47 = vadd.f32 %v888_v38, %v848_v43 }
 0x147   : > { %v890_v41 = vpop.f32.mrf.mxu0  ;;  %v931_v42 = vpop.f32.mrf.mxu1 }
 0x148   : > { %v930_v53 = vadd.f32 %v929_v39, %v889_v47 }
 0x149   : > { %v967_v44 = vpop.f32.mrf.mxu0  ;;  %v1008_v45 = vpop.f32.mrf.mxu1 }
 0x14a   : > { %v968_v50 = vadd.f32 %v967_v44, %v927_v46 }
 0x14b   : > { %v969_v48 = vpop.f32.mrf.mxu0  ;;  %v1010_v49 = vpop.f32.mrf.mxu1 }
 0x14c   : > { %v1009_v56 = vadd.f32 %v1008_v45, %v968_v50 }
 0x14d   : > { %v970_v51 = vpop.f32.mrf.mxu0  ;;  %v1011_v52 = vpop.f32.mrf.mxu1 }
 0x14e   : > { %v971_v57 = vadd.f32 %v970_v51, %v930_v53 }
 0x14f   : > { %v972_v54 = vpop.f32.mrf.mxu0  ;;  %v1013_v55 = vpop.f32.mrf.mxu1 }
 0x150   : > { %v1012_v61 = vadd.f32 %v1011_v52, %v971_v57 }
 0x151   : > { %v1049_v58 = vpop.f32.mrf.mxu0 }
 0x152   : > { %v1050_v59 = vadd.f32 %v1049_v58, %v1009_v56 }
 0x153   : > { %v1695_v60 = vpop.f32.mrf.mxu0 }
 0x154   : > { %1059 = vst.msk [vmem:[%s1057_s18] sm:$0xff] %vm1058_vm3, %v1050_v59  ;;  %v1075_v63 = vmul.f32 %v1050_v59, %v1050_v59  ;;  %v1062_v2 = vsel %vm1058_vm3, %v1050_v59, 0.0 }
 0x155   : > { %v1052_v62 = vpop.f32.mrf.mxu0 }
 0x156   : > { %v1053_v0 = vadd.f32 %v1052_v62, %v1012_v61  ;;  %v1077_v6 = vsel %vm1058_vm3, %v1075_v63, 0.0 }
 0x157   : > { %v1696_v1 = vpop.f32.mrf.mxu0 }
 0x158   : > { %1060 = vst.msk [vmem:[%s1057_s18 + $0x8] sm:$0xff] %vm1058_vm3, %v1053_v0  ;;  %v1063_v3 = vsel %vm1058_vm3, %v1053_v0, 0.0  ;;  %v1076_v4 = vmul.f32 %v1053_v0, %v1053_v0 }
 0x159   : > { %v1064_v5 = vadd.f32 %v1063_v3, %v1062_v2 }
 0x15a   : > { %v1078_v7 = vsel %vm1058_vm3, %v1076_v4, 0.0 }
 0x15b   : > { %v1065_v8 = vrot.slane %v1064_v5, 4  ;;  %v1079_v9 = vadd.f32 %v1078_v7, %v1077_v6 }
 0x15d   : > { %v1066_v10 = vadd.f32 %v1065_v8, %v1064_v5  ;;  %v1080_v11 = vrot.slane %v1079_v9, 4 }
 0x15f   : > { %v1067_v12 = vrot.slane %v1066_v10, 2  ;;  %v1081_v13 = vadd.f32 %v1080_v11, %v1079_v9 }
 0x161   : > { %v1068_v14 = vadd.f32 %v1067_v12, %v1066_v10  ;;  %v1082_v15 = vrot.slane %v1081_v13, 2 }
 0x163   : > { %v1069_v16 = vrot.slane %v1068_v14, 1  ;;  %v1083_v17 = vadd.f32 %v1082_v15, %v1081_v13 }
 0x165   : > { %v1070_v19 = vadd.f32 %v1069_v16, %v1068_v14  ;;  %v1084_v20 = vrot.slane %v1083_v17, 1 }
 0x167   : > { %v1071_v22 = vadd.f32 %v1070_v19, %v1061_v18  ;;  %v1085_v23 = vadd.f32 %v1084_v20, %v1083_v17  ;;  %1091 = sbr.rel (%p1665_p13) target bundleno = 1214 (0x4be), region = 52 }
 0x169   : > { %1073 = vst.msk [vmem:[#allocation3] sm:$0x1] %vm1072_vm4, %v1071_v22  ;;  %v1086_v24 = vadd.f32 %v1085_v23, %v1074_v21 }
 0x16b   : > { %1087 = vst.msk [vmem:[#allocation3 + $0x1] sm:$0x1] %vm1072_vm4, %v1086_v24 }
 0x16c   : > { %v1093_v25 = vld [vmem:[#allocation8 + $0x8] sm:$0xff]  ;;  %v1092_v26 = vld [vmem:[#allocation8] sm:$0xff]  ;;  %v1124_v33 = vlaneseq  ;;  %v1116_v40 = vld [vmem:[#allocation2 + $0x10] sm:$0xff]  ;;  %vm1340_vm5 = vcmask 1041408   ;;  %vm1263_vm6 = vcmask 80896  }
 0x16d   : > { %1697 = vmatprep.subr.mxu0 %v1093_v25  ;;  %v1114_v37 = vld [vmem:[#allocation2] sm:$0xff]  ;;  %v1115_v39 = vld [vmem:[#allocation2 + $0x8] sm:$0xff]  ;;  %v1117_v41 = vld [vmem:[#allocation2 + $0x18] sm:$0xff] }
 0x16e   : > { %1698 = vmatpush3.msra.mxu0 %v1093_v25  ;;  %v2196_v35 = vshrl.u32 %v1124_v33, 7  ;;  %v2199_v42 = vld [vmem:[#allocation8 + $0x20] sm:$0xff]  ;;  %v1095_v4 = vld [vmem:[#allocation8 + $0x18] sm:$0xff]  ;;  %v1094_v5 = vld [vmem:[#allocation8 + $0x10] sm:$0xff] }
 0x16f   : > { %1699 = vmatprep.subr.mxu0 %v1092_v26  ;;  %1707 = vmatprep.subr.msk.mxu1 %vm1340_vm5, %v1095_v4 }
 0x170   : > { %v1118_v27 = vld [vmem:[#allocation3] sm:$0x1]  ;;  %1700 = vmatpush3.msra.mxu0 %v1092_v26  ;;  %v1126_v36 = vsub.s32 0, %v2196_v35  ;;  %v1152_v43 = vsub.s32 1, %v2196_v35  ;;  %1708 = vmatpush3.msk.msra.mxu1 %vm1340_vm5, %v1095_v4 }
 0x171   : > { %v1119_v29 = vmul.f32 0.041666668, %v1118_v27  ;;  %1709 = vmatprep.subr.mxu1 %v1094_v5 }
 0x172   : > { %v1120_v28 = vld [vmem:[#allocation3 + $0x1] sm:$0x1]  ;;  %v1145_v50 = vrot.slane %v2199_v42, %v1126_v36  ;;  %v1153_v51 = vrot.slane %v2199_v42, %v1152_v43  ;;  %1710 = vmatpush3.msra.mxu1 %v1094_v5 }
 0x173   : > { %v1121_v30 = vmul.f32 0.041666668, %v1120_v28  ;;  %v1122_v31 = vmul.f32 %v1119_v29, %v1119_v29  ;;  %v1127_v38 = vrot.slane %v1119_v29, %v1126_v36 }
 0x175   : > { %v1123_v32 = vsub.f32 %v1121_v30, %v1122_v31  ;;  %v1128_v44 = vsub.f32 %v1114_v37, %v1127_v38  ;;  %v1129_v45 = vsub.f32 %v1115_v39, %v1127_v38  ;;  %v1130_v46 = vsub.f32 %v1116_v40, %v1127_v38 }
 0x176   : > { %v1131_v47 = vsub.f32 %v1117_v41, %v1127_v38 }
 0x177   : > { %v1132_v34 = vadd.f32 1e-05, %v1123_v32 }
 0x179   : > { %1861 = vrsqrt.f32 %v1132_v34 }
 0x186   : > { %v1862_v48 = vpop.eup %1861 }
 0x187   : > { %v1137_v49 = vrot.slane %v1862_v48, %v1126_v36  ;;  %v1310_v48 = vsub.s32 2, %v2196_v35 }
 0x189   : > { %v1138_v52 = vmul.f32 %v1137_v49, %v1128_v44  ;;  %v1139_v53 = vmul.f32 %v1137_v49, %v1129_v45  ;;  %v1140_v54 = vmul.f32 %v1137_v49, %v1130_v46  ;;  %v1141_v55 = vmul.f32 %v1137_v49, %v1131_v47 }
 0x18a   : > { %v1318_v49 = vsub.s32 3, %v2196_v35 }
 0x18b   : > { %v1146_v56 = vmul.f32 %v1145_v50, %v1138_v52  ;;  %v1147_v57 = vmul.f32 %v1145_v50, %v1139_v53  ;;  %v1148_v58 = vmul.f32 %v1145_v50, %v1140_v54  ;;  %v1149_v59 = vmul.f32 %v1145_v50, %v1141_v55 }
 0x18c   : > { %v1311_v50 = vrot.slane %v2199_v42, %v1310_v48 }
 0x18d   : > { %v1154_v60 = vadd.f32 %v1153_v51, %v1146_v56  ;;  %v1155_v61 = vadd.f32 %v1153_v51, %v1147_v57  ;;  %v1156_v62 = vadd.f32 %v1153_v51, %v1148_v58  ;;  %v1157_v63 = vadd.f32 %v1153_v51, %v1149_v59 }
 0x18e   : > { %v1319_v56 = vrot.slane %v2199_v42, %v1318_v49 }
 0x18f   : > { %v1158_v0 = vmax.f32 %v1154_v60, 0.0  ;;  %v1159_v1 = vmax.f32 %v1155_v61, 0.0  ;;  %v1160_v2 = vmax.f32 %v1156_v62, 0.0  ;;  %v1161_v3 = vmax.f32 %v1157_v63, 0.0 }
 0x191   : > { %1701 = vmatprep.mubr.msk.f32.mxu0 %vm1058_vm3, %v1158_v0 }
 0x192   : > { %1702 = vmatmul.mubr.msk.f32.vlgmr.msra.gmra.mxu0 %vm1058_vm3, %v1159_v1 }
 0x193   : > { %1704 = vmatprep.mubr.msk.f32.mxu0 %vm1058_vm3, %v1160_v2 }
 0x196   : > { %1705 = vmatmul.mubr.msk.f32.gmra.mxu0 %vm1058_vm3, %v1161_v3 }
 0x252   : > { %v1703_v6 = vpop.f32.mrf.mxu0 }
 0x253   : > { %v1279_v8 = vmul.f32 %v1703_v6, %v1703_v6  ;;  %v1265_v12 = vsel %vm1263_vm6, %v1703_v6, 0.0 }
 0x254   : > { %v1240_v7 = vpop.f32.mrf.mxu0 }
 0x255   : > { %v1264_v9 = vsel %vm1263_vm6, %v1240_v7, 0.0  ;;  %v1278_v10 = vmul.f32 %v1240_v7, %v1240_v7  ;;  %v1283_v17 = vsel %vm1263_vm6, %v1279_v8, 0.0 }
 0x256   : > { %v1706_v11 = vpop.f32.mrf.mxu0  ;;  %v1266_v15 = vadd.f32 %v1265_v12, %v1264_v9 }
 0x257   : > { %v1282_v13 = vsel %vm1263_vm6, %v1278_v10, 0.0  ;;  %v1262_v14 = vmul.f32 0.0, %v1706_v11 }
 0x258   : > { %v1250_v16 = vpop.f32.mrf.mxu0  ;;  %v1284_v21 = vadd.f32 %v1283_v17, %v1282_v13 }
 0x259   : > { %v1281_v18 = vmul.f32 %v1262_v14, %v1262_v14  ;;  %v1267_v19 = vsel %vm1263_vm6, %v1250_v16, 0.0  ;;  %v1280_v20 = vmul.f32 %v1250_v16, %v1250_v16  ;;  %v1269_v23 = vsel %vm1263_vm6, %v1262_v14, 0.0 }
 0x25a   : > { %v1268_v22 = vadd.f32 %v1267_v19, %v1266_v15 }
 0x25b   : > { %v1285_v24 = vsel %vm1263_vm6, %v1280_v20, 0.0  ;;  %v1287_v27 = vsel %vm1263_vm6, %v1281_v18, 0.0 }
 0x25c   : > { %v1270_v25 = vadd.f32 %v1269_v23, %v1268_v22  ;;  %v1286_v26 = vadd.f32 %v1285_v24, %v1284_v21 }
 0x25e   : > { %v1271_v28 = vrot.slane %v1270_v25, 4  ;;  %v1288_v29 = vadd.f32 %v1287_v27, %v1286_v26 }
 0x260   : > { %v1272_v30 = vadd.f32 %v1271_v28, %v1270_v25  ;;  %v1289_v31 = vrot.slane %v1288_v29, 4 }
 0x262   : > { %v1273_v32 = vrot.slane %v1272_v30, 2  ;;  %v1290_v33 = vadd.f32 %v1289_v31, %v1288_v29 }
 0x264   : > { %v1274_v34 = vadd.f32 %v1273_v32, %v1272_v30  ;;  %v1291_v36 = vrot.slane %v1290_v33, 2 }
 0x266   : > { %v1275_v37 = vrot.slane %v1274_v34, 1  ;;  %v1292_v38 = vadd.f32 %v1291_v36, %v1290_v33 }
 0x268   : > { %v1276_v39 = vadd.f32 %v1275_v37, %v1274_v34  ;;  %v1293_v40 = vrot.slane %v1292_v38, 1 }
 0x26a   : > { %v1277_v41 = vmul.f32 0.041666668, %v1276_v39  ;;  %v1294_v43 = vadd.f32 %v1293_v40, %v1292_v38 }
 0x26c   : > { %v1295_v44 = vmul.f32 0.041666668, %v1294_v43  ;;  %v1296_v45 = vmul.f32 %v1277_v41, %v1277_v41  ;;  %v1300_v51 = vsub.f32 %v1250_v16, %v1277_v41  ;;  %v1298_v52 = vsub.f32 %v1240_v7, %v1277_v41 }
 0x26d   : > { %v1299_v53 = vsub.f32 %v1703_v6, %v1277_v41  ;;  %v1301_v54 = vsub.f32 %v1706_v11, %v1277_v41 }
 0x26e   : > { %v1297_v46 = vsub.f32 %v1295_v44, %v1296_v45 }
 0x270   : > { %v1302_v47 = vadd.f32 1e-05, %v1297_v46 }
 0x272   : > { %1863 = vrsqrt.f32 %v1302_v47 }
 0x27f   : > { %v1864_v55 = vpop.eup %1863 }
 0x280   : > { %v1306_v57 = vmul.f32 %v1864_v55, %v1300_v51  ;;  %v1304_v58 = vmul.f32 %v1864_v55, %v1298_v52  ;;  %v1305_v59 = vmul.f32 %v1864_v55, %v1299_v53  ;;  %v1307_v60 = vmul.f32 %v1864_v55, %v1301_v54 }
 0x281   : > { %v1479_v51 = vsub.s32 4, %v2196_v35  ;;  %v1487_v52 = vsub.s32 5, %v2196_v35 }
 0x282   : > { %v1314_v61 = vmul.f32 %v1311_v50, %v1306_v57  ;;  %v1312_v62 = vmul.f32 %v1311_v50, %v1304_v58  ;;  %v1313_v63 = vmul.f32 %v1311_v50, %v1305_v59  ;;  %v1315_v0 = vmul.f32 %v1311_v50, %v1307_v60 }
 0x283   : > { %v1480_v53 = vrot.slane %v2199_v42, %v1479_v51  ;;  %v1488_v59 = vrot.slane %v2199_v42, %v1487_v52 }
 0x284   : > { %v1322_v1 = vadd.f32 %v1319_v56, %v1314_v61  ;;  %v1320_v2 = vadd.f32 %v1319_v56, %v1312_v62  ;;  %v1321_v3 = vadd.f32 %v1319_v56, %v1313_v63  ;;  %v1323_v8 = vadd.f32 %v1319_v56, %v1315_v0 }
 0x286   : > { %v1324_v4 = vmax.f32 %v1320_v2, 0.0  ;;  %v1325_v5 = vmax.f32 %v1321_v3, 0.0  ;;  %v1326_v6 = vmax.f32 %v1322_v1, 0.0  ;;  %v1327_v7 = vmax.f32 %v1323_v8, 0.0 }
 0x288   : > { %1711 = vmatprep.mubr.msk.f32.mxu1 %vm1263_vm6, %v1324_v4 }
 0x289   : > { %1712 = vmatmul.mubr.msk.f32.vlgmr.msra.gmra.mxu1 %vm1263_vm6, %v1325_v5 }
 0x28a   : > { %1714 = vmatprep.mubr.msk.f32.mxu1 %vm1263_vm6, %v1326_v6 }
 0x28d   : > { %1715 = vmatmul.mubr.msk.f32.gmra.mxu1 %vm1263_vm6, %v1327_v7 }
 0x349   : > { %v1713_v9 = vpop.f32.mrf.mxu1 }
 0x34a   : > { %v1448_v11 = vmul.f32 %v1713_v9, %v1713_v9  ;;  %v1434_v15 = vsel %vm1263_vm6, %v1713_v9, 0.0 }
 0x34b   : > { %v1410_v10 = vpop.f32.mrf.mxu1 }
 0x34c   : > { %v1433_v12 = vsel %vm1263_vm6, %v1410_v10, 0.0  ;;  %v1447_v13 = vmul.f32 %v1410_v10, %v1410_v10  ;;  %v1452_v20 = vsel %vm1263_vm6, %v1448_v11, 0.0 }
 0x34d   : > { %v1716_v14 = vpop.f32.mrf.mxu1  ;;  %v1435_v18 = vadd.f32 %v1434_v15, %v1433_v12 }
 0x34e   : > { %v1451_v16 = vsel %vm1263_vm6, %v1447_v13, 0.0  ;;  %v1432_v17 = vmul.f32 0.0, %v1716_v14 }
 0x34f   : > { %v1420_v19 = vpop.f32.mrf.mxu1  ;;  %v1453_v24 = vadd.f32 %v1452_v20, %v1451_v16 }
 0x350   : > { %v1450_v21 = vmul.f32 %v1432_v17, %v1432_v17  ;;  %v1436_v22 = vsel %vm1263_vm6, %v1420_v19, 0.0  ;;  %v1449_v23 = vmul.f32 %v1420_v19, %v1420_v19  ;;  %v1438_v26 = vsel %vm1263_vm6, %v1432_v17, 0.0 }
 0x351   : > { %v1437_v25 = vadd.f32 %v1436_v22, %v1435_v18 }
 0x352   : > { %v1454_v27 = vsel %vm1263_vm6, %v1449_v23, 0.0  ;;  %v1456_v30 = vsel %vm1263_vm6, %v1450_v21, 0.0 }
 0x353   : > { %v1439_v28 = vadd.f32 %v1438_v26, %v1437_v25  ;;  %v1455_v29 = vadd.f32 %v1454_v27, %v1453_v24 }
 0x355   : > { %v1440_v31 = vrot.slane %v1439_v28, 4  ;;  %v1457_v32 = vadd.f32 %v1456_v30, %v1455_v29 }
 0x357   : > { %v1441_v33 = vadd.f32 %v1440_v31, %v1439_v28  ;;  %v1458_v34 = vrot.slane %v1457_v32, 4 }
 0x359   : > { %v1442_v36 = vrot.slane %v1441_v33, 2  ;;  %v1459_v37 = vadd.f32 %v1458_v34, %v1457_v32 }
 0x35b   : > { %v1443_v38 = vadd.f32 %v1442_v36, %v1441_v33  ;;  %v1460_v39 = vrot.slane %v1459_v37, 2 }
 0x35d   : > { %v1444_v40 = vrot.slane %v1443_v38, 1  ;;  %v1461_v41 = vadd.f32 %v1460_v39, %v1459_v37 }
 0x35f   : > { %v1445_v43 = vadd.f32 %v1444_v40, %v1443_v38  ;;  %v1462_v44 = vrot.slane %v1461_v41, 1 }
 0x361   : > { %v1446_v45 = vmul.f32 0.041666668, %v1445_v43  ;;  %v1463_v46 = vadd.f32 %v1462_v44, %v1461_v41 }
 0x363   : > { %v1464_v47 = vmul.f32 0.041666668, %v1463_v46  ;;  %v1465_v48 = vmul.f32 %v1446_v45, %v1446_v45  ;;  %v1469_v54 = vsub.f32 %v1420_v19, %v1446_v45  ;;  %v1467_v55 = vsub.f32 %v1410_v10, %v1446_v45 }
 0x364   : > { %v1470_v56 = vsub.f32 %v1716_v14, %v1446_v45  ;;  %v1468_v57 = vsub.f32 %v1713_v9, %v1446_v45 }
 0x365   : > { %v1466_v49 = vsub.f32 %v1464_v47, %v1465_v48 }
 0x367   : > { %v1471_v50 = vadd.f32 1e-05, %v1466_v49 }
 0x369   : > { %1865 = vrsqrt.f32 %v1471_v50 }
 0x376   : > { %v1866_v58 = vpop.eup %1865 }
 0x377   : > { %v1475_v60 = vmul.f32 %v1866_v58, %v1469_v54  ;;  %v1473_v61 = vmul.f32 %v1866_v58, %v1467_v55  ;;  %v1476_v62 = vmul.f32 %v1866_v58, %v1470_v56  ;;  %v1474_v63 = vmul.f32 %v1866_v58, %v1468_v57 }
 0x379   : > { %v1483_v0 = vmul.f32 %v1480_v53, %v1475_v60  ;;  %v1481_v1 = vmul.f32 %v1480_v53, %v1473_v61  ;;  %v1484_v2 = vmul.f32 %v1480_v53, %v1476_v62  ;;  %v1482_v3 = vmul.f32 %v1480_v53, %v1474_v63 }
 0x37b   : > { %v1491_v4 = vadd.f32 %v1488_v59, %v1483_v0  ;;  %v1489_v5 = vadd.f32 %v1488_v59, %v1481_v1  ;;  %v1492_v6 = vadd.f32 %v1488_v59, %v1484_v2  ;;  %v1490_v7 = vadd.f32 %v1488_v59, %v1482_v3 }
 0x37d   : > { %v1499_v35 = vsel %vm1263_vm6, %v1491_v4, -inf  ;;  %v1493_v8 = vsel %vm1263_vm6, %v1489_v5, -inf  ;;  %v1502_v42 = vsel %vm1263_vm6, %v1492_v6, -inf  ;;  %v1496_v9 = vsel %vm1263_vm6, %v1490_v7, -inf }
 0x37e   : > { %1500 = vmax.xlane.f32.xlu1 %v1499_v35  ;;  %1494 = vmax.xlane.f32.xlu0 %v1493_v8 }
 0x382   : > { %1503 = vmax.xlane.f32.xlu1 %v1502_v42  ;;  %1497 = vmax.xlane.f32.xlu0 %v1496_v9 }
 0x407   : > { %v1501_v10 = vpop.xlane.xlu1 %1500  ;;  %v1495_v11 = vpop.xlane.xlu0 %1494 }
 0x408   : > { %v1507_v12 = vsub.f32 %v1491_v4, %v1501_v10  ;;  %v1505_v13 = vsub.f32 %v1489_v5, %v1495_v11 }
 0x40a   : > { %v1509_v14 = vmul.f32 1.442695, %v1505_v13  ;;  %v1513_v15 = vmul.f32 1.442695, %v1507_v12 }
 0x40b   : > { %v1504_v16 = vpop.xlane.xlu1 %1503  ;;  %v1498_v17 = vpop.xlane.xlu0 %1497 }
 0x40c   : > { %v1508_v18 = vsub.f32 %v1492_v6, %v1504_v16  ;;  %v1506_v19 = vsub.f32 %v1490_v7, %v1498_v17  ;;  %1867 = vpow2.f32 %v1509_v14 }
 0x40d   : > { %1869 = vpow2.f32 %v1513_v15 }
 0x40e   : > { %v1511_v20 = vmul.f32 1.442695, %v1506_v19  ;;  %v1515_v21 = vmul.f32 1.442695, %v1508_v18 }
 0x410   : > { %1871 = vpow2.f32 %v1511_v20 }
 0x411   : > { %1873 = vpow2.f32 %v1515_v21 }
 0x419   : > { %v1868_v22 = vpop.eup %1867 }
 0x41a   : > { %v1517_v23 = vsel %vm1263_vm6, %v1868_v22, 0.0  ;;  %v1870_v24 = vpop.eup %1869 }
 0x41b   : > { %1518 = vadd.xlane.f32.xlu0 %v1517_v23  ;;  %v1523_v26 = vsel %vm1263_vm6, %v1870_v24, 0.0 }
 0x41d   : > { %v1872_v25 = vpop.eup %1871 }
 0x41e   : > { %v1520_v27 = vsel %vm1263_vm6, %v1872_v25, 0.0  ;;  %v1874_v28 = vpop.eup %1873 }
 0x41f   : > { %1524 = vadd.xlane.f32.xlu0 %v1523_v26  ;;  %1521 = vadd.xlane.f32.xlu1 %v1520_v27  ;;  %v1526_v29 = vsel %vm1263_vm6, %v1874_v28, 0.0 }
 0x423   : > { %1527 = vadd.xlane.f32.xlu1 %v1526_v29 }
 0x4a4   : > { %v1519_v30 = vpop.xlane.xlu0 %1518 }
 0x4a5   : > { %1875 = vrcp.f32 %v1519_v30 }
 0x4a8   : > { %v1522_v31 = vpop.xlane.xlu1 %1521  ;;  %v1525_v32 = vpop.xlane.xlu0 %1524 }
 0x4a9   : > { %1877 = vrcp.f32 %v1522_v31 }
 0x4aa   : > { %1879 = vrcp.f32 %v1525_v32 }
 0x4ac   : > { %v1528_v33 = vpop.xlane.xlu1 %1527 }
 0x4ad   : > { %1881 = vrcp.f32 %v1528_v33 }
 0x4b2   : > { %v1876_v34 = vpop.eup %1875 }
 0x4b3   : > { %v1533_v36 = vmul.f32 %v1876_v34, %v1868_v22 }
 0x4b5   : > { %1537 = vst.msk [vmem:[%s2276_s3] sm:$0xff] %vm1263_vm6, %v1533_v36 }
 0x4b6   : > { %v1878_v37 = vpop.eup %1877 }
 0x4b7   : > { %v1880_v38 = vpop.eup %1879  ;;  %v1534_v39 = vmul.f32 %v1878_v37, %v1872_v25 }
 0x4b8   : > { %v1535_v40 = vmul.f32 %v1880_v38, %v1870_v24 }
 0x4b9   : > { %1538 = vst.msk [vmem:[%s2276_s3 + $0x8] sm:$0xff] %vm1263_vm6, %v1534_v39 }
 0x4ba   : > { %v1882_v41 = vpop.eup %1881  ;;  %1539 = vst.msk [vmem:[%s2276_s3 + $0x10] sm:$0xff] %vm1263_vm6, %v1535_v40 }
 0x4bb   : > { %v1536_v43 = vmul.f32 %v1882_v41, %v1874_v28 }
 0x4bd   : > { %1540 = vst.msk [vmem:[%s2276_s3 + $0x18] sm:$0xff] %vm1263_vm6, %v1536_v43 }
 0x4be PF: > { %p14_p2 = scmp.ge.s32.totalorder %s2099_s7, 4   ;;  %s2289_s12 = smov %s1993_s13 }
 0x4bf   : > { %s2290_s13 = smov %s1997_s14  ;;  %s2291_s14 = smov %s2108_s10 }
 0x4c0   : > { %s2292_s15 = smov %s2099_s7  ;;  %16 = sbr.rel (!%p14_p2) target bundleno = 4 (0x4), region = 85 }
 0x4c5   :  { %1552 = vsyncpa [#allocation5], 1 }
 0x4c6   :  { %1554 = vsyncpa [#allocation5 + $0x1], 1 }
 0x4c7   :  { %1555 = vsyncpa [#allocation7], 1 }

</bundles_post_ra>
